<compile_context>
chip_gen: v6e
topology: v6e:2x2x1
jax: 0.10.0
libtpu: 0.0.40
codegen_flags: <defaults>
</compile_context>

<pallas_src>
import math

import jax
import jax.numpy as jnp
from jax import lax
from jax.experimental import pallas as pl
from jax.experimental.pallas import tpu as pltpu


# ---------------------------------------------------------------------------
# Constants matching the module's __init__ semantics (small synthetic sizes)
# ---------------------------------------------------------------------------
NUM_ANCHORS = 2          # post_module.num_anchors (also the hard-coded `// 2`)
NUM_CLASSES_M1 = 4       # post_module.num_classes - 1
NUM_IDS = 8              # post_module.num_ids
PRIOR = 0.01             # init_prior

ROI_MAPPINGS = {0: 'cls', 1: 'loc', 2: 'id'}
ROI_PRED_DIMS = {0: NUM_CLASSES_M1, 1: 4, 2: NUM_IDS}
RELATION_INDICES = {0: 0, 2: 1}   # relations on 'cls' and 'id' features


# ---------------------------------------------------------------------------
# Pallas kernel: fused relation (cross-attention) + 1x1-conv prediction head
# One (level, head) group per grid step; the batch axis lives in the block.
# ---------------------------------------------------------------------------
def _fused_relation_heads_kernel(m_valid_ref, q_ref, kv_ref, w_ref, b_ref,
                                 out_ref):
    """m_valid_ref : SMEM (G,) int32  valid kv length for this group (rest padded)
    q_ref       : (1, B, N, C) bf16  main roi features (query / residual source)
    kv_ref      : (1, B, M, C) bf16  concatenated reference roi features
    w_ref       : (1, C, P)    bf16  packed [I_C | W_head^T | 0], P multiple of 128
    b_ref       : (1, 1, P)    f32   packed [0_C | bias     | 0]
    out_ref     : (1, B, N, P) bf16  slab: [..., :C]=refined feats, [..., C:C+O]=preds
    """
    g = pl.program_id(0)
    m_valid = m_valid_ref[g]

    q = q_ref[0]                                      # (B, N, C) bf16
    kv = kv_ref[0]                                    # (B, M, C) bf16
    c = q.shape[-1]
    scale = 1.0 / math.sqrt(c)

    # TODO(synk): the real relation module is built from MODULE_ZOO_REGISTRY
    # (type comes from relation_cfgs); we implement a generic scaled-dot
    # cross-attention relation with a residual connection.

    qf = q.astype(jnp.float32)                        # f32 residual source
    q_s = (qf * scale).astype(jnp.bfloat16)           # fold 1/sqrt(C) into q

    # scores: batched contraction on the last axes (no in-kernel transposes)
    s = jnp.einsum('bnc,bmc->bnm', q_s, kv,
                   preferred_element_type=jnp.float32)           # (B,N,M) f32

    # mask kv columns that are padding introduced by the FPN-level fusion
    col = lax.broadcasted_iota(jnp.int32, s.shape, dimension=2)
    s = jnp.where(col < m_valid, s, -1e30)

    # numerically-stable softmax; exp in bf16 (bf16 EUP on v6e/v7x), f32 sum
    s = s - jnp.max(s, axis=-1, keepdims=True)
    p = jnp.exp(s.astype(jnp.bfloat16))                          # (B,N,M) bf16
    row_sum = jnp.sum(p.astype(jnp.float32), axis=-1, keepdims=True)

    # un-normalized PV on the MXU, normalized on the EUP (approx reciprocal)
    pv = jnp.einsum('bnm,bmc->bnc', p, kv,
                    preferred_element_type=jnp.float32)          # (B,N,C) f32
    refined = qf + pv * pl.reciprocal(row_sum, approx=True)      # (B,N,C) f32

    # fused [identity | 1x1-conv head] matmul -> single lane-dense (·, P) slab
    bsz, nq, cdim = refined.shape
    r2 = refined.astype(jnp.bfloat16).reshape(bsz * nq, cdim)
    slab = jnp.dot(r2, w_ref[0], preferred_element_type=jnp.float32)
    slab = slab.reshape(bsz, nq, -1) + b_ref[0]                  # (B,N,P) f32
    out_ref[0] = slab.astype(out_ref.dtype)

    # TODO(synk): for production sizes (N~1200, M~600-900) tile the kv/M axis
    # with an online-softmax accumulator instead of the full (N, M) score tile
    # (mandatory within v7x's 64 MiB VMEM).


def fused_relation_heads(m_valid, q, kv, w_comb, b_comb):
    """m_valid (G,) i32, q (G,B,N,C) bf16, kv (G,B,M,C) bf16,
    w_comb (G,C,P) bf16, b_comb (G,1,P) f32 ->
    slab (G,B,N,P) bf16 with slab[...,:C]=refined feats, slab[...,C:]=preds."""
    G, Bv, N, C = q.shape
    M = kv.shape[2]
    P = w_comb.shape[-1]

    # footprint-derived VMEM limit: double-buffered blocks + live temps (+25%)
    block_bytes = (Bv * N * C * 2 + Bv * M * C * 2 + C * P * 2 + P * 4
                   + Bv * N * P * 2)
    temp_bytes = (Bv * N * M * (4 + 2)           # f32 scores + bf16 probs
                  + 3 * Bv * N * C * 4           # qf / pv / refined
                  + Bv * N * P * 4)              # f32 slab accumulator
    footprint = 2 * block_bytes + temp_bytes
    vmem_limit = int(min(max(footprint + footprint // 4, 4 << 20), 100 << 20))

    return pl.pallas_call(
        _fused_relation_heads_kernel,
        out_shape=jax.ShapeDtypeStruct((G, Bv, N, P), jnp.bfloat16),
        grid_spec=pltpu.PrefetchScalarGridSpec(
            num_scalar_prefetch=1,
            grid=(G,),
            in_specs=[
                pl.BlockSpec((1, Bv, N, C), lambda g, mv: (g, 0, 0, 0)),
                pl.BlockSpec((1, Bv, M, C), lambda g, mv: (g, 0, 0, 0)),
                pl.BlockSpec((1, C, P), lambda g, mv: (g, 0, 0)),
                pl.BlockSpec((1, 1, P), lambda g, mv: (g, 0, 0)),
            ],
            out_specs=pl.BlockSpec((1, Bv, N, P), lambda g, mv: (g, 0, 0, 0)),
        ),
        compiler_params=pltpu.CompilerParams(
            # G = levels*heads = 4 parallel points -> v7x 2-TC split survives
            dimension_semantics=("parallel",),
            vmem_limit_bytes=vmem_limit),
    )(m_valid, q, kv, w_comb, b_comb)


def pack_head(w, b, c, p):
    """Pack one 1x1-conv head into a lane-dense [I_C | W^T | 0] slab of width p.

    w (O, c), b (O,) -> weight (c, p) bf16, bias (1, p) f32 so that
    `refined @ W + b` yields [refined | head prediction | zero pad] in one
    matmul / one wide unmasked store.
    """
    o = w.shape[0]
    wc = jnp.zeros((c, p), jnp.float32)
    wc = wc.at[:, :c].set(jnp.eye(c, dtype=jnp.float32))
    wc = wc.at[:, c:c + o].set(w.T)
    bc = jnp.zeros((p,), jnp.float32).at[c:c + o].set(b)
    return wc.astype(jnp.bfloat16), bc[None, :]


def pad_rows(x, n):
    """Zero-pad (B, rows, C) along axis 1 up to n rows."""
    pad = n - x.shape[1]
    if pad == 0:
        return x
    return jnp.pad(x, ((0, 0), (0, pad), (0, 0)))


# ---------------------------------------------------------------------------
# Plain-JAX glue mirroring the PyTorch forward's bookkeeping
# ---------------------------------------------------------------------------
def prepare_pred(raw, k):
    """NCHW raw head output (B, dim*k, H, W) -> prepared (B, H*W*k, dim)."""
    b, ck, h, w = raw.shape
    c = ck // k
    return jnp.transpose(raw, (0, 2, 3, 1)).reshape(b, h * w * k, c)


def get_top_feats(feats, indices, is_pred=False):
    """Faithful port of RelationRetina.get_top_feats (gather along anchor axis)."""
    if feats is None:
        return None
    if feats.ndim == 4:
        b, c, h, w = feats.shape
        if not is_pred:
            feats = jnp.transpose(feats, (0, 2, 3, 1)).reshape(b, h * w, c)
            indices = indices // 2          # hard-coded // 2 as in the module
        else:
            k = NUM_ANCHORS
            c = c // k
            feats = jnp.transpose(feats, (0, 2, 3, 1)).reshape(b, h * w * k, c)
    c = feats.shape[2]
    gidx = jnp.broadcast_to(indices[:, :, None], indices.shape + (c,))
    return jnp.take_along_axis(feats, gidx, axis=1)


def get_selected_indices(lvl_preds_act, num):
    # TODO(synk): real module uses per-image NMS (predictor.lvl_nms); no Pallas
    # equivalent — synthetic selection is top-k by max activated class score.
    cls_scores = jnp.max(lvl_preds_act[0], axis=-1)   # (B, A)
    _, idx = jax.lax.top_k(cls_scores, num)
    return idx                                        # (B, num) int32


def init_params(key, inplanes):
    """Deterministic 1x1-conv head params (shapes from __init__)."""
    bias_val = -math.log((1 - PRIOR) / PRIOR)
    params = {}
    cls_ws = []
    for c in inplanes:                                # 'cls' head: per-level conv
        key, k1 = jax.random.split(key)
        cls_ws.append((0.01 * jax.random.normal(k1, (ROI_PRED_DIMS[0], c), jnp.float32),
                       jnp.full((ROI_PRED_DIMS[0],), bias_val, jnp.float32)))
    params['cls_preds'] = cls_ws
    key, k2 = jax.random.split(key)                   # 'id' head: single shared conv
    params['id_preds'] = (0.01 * jax.random.normal(k2, (ROI_PRED_DIMS[2], inplanes[-1]),
                                                   jnp.float32),
                          jnp.full((ROI_PRED_DIMS[2],), bias_val, jnp.float32))
    return params


def relation_retina_forward(data, params, inplanes, num_to_refine=8, num_as_ref=4):
    """Inference-path forward of RelationRetina."""
    size_factors = []
    for i in range(len(inplanes)):
        size_factors.insert(0, 1 << (i << 1))
    m = len(data['ref'])
    B = data['main']['preds'][0][0].shape[0]
    L = len(inplanes)

    # TODO(synk): level fusion assumes a shared embed dim across FPN levels;
    # ragged channel sizes would additionally need C padding or per-C launches.
    assert len(set(inplanes)) == 1
    C = inplanes[0]
    P = ((C + max(ROI_PRED_DIMS[0], ROI_PRED_DIMS[2]) + 127) // 128) * 128

    # prepare_preds: raw NCHW head outputs -> (B, A, dim) per level
    def prep(preds_lvl):
        return [prepare_pred(p, NUM_ANCHORS) for p in preds_lvl]
    mlvl_preds = [prep(p) for p in data['main']['preds']]
    mlvl_preds_ref = [[prep(p) for p in o['preds']] for o in data['ref']]

    # apply_activation: sigmoid on cls / id / iou, identity on loc
    def activate(pl_lvl):
        return [jax.nn.sigmoid(pl_lvl[0]), pl_lvl[1],
                jax.nn.sigmoid(pl_lvl[2]), jax.nn.sigmoid(pl_lvl[3])]
    mlvl_preds_act = [activate(p) for p in mlvl_preds]
    mlvl_preds_ref_act = [[activate(p) for p in o] for o in mlvl_preds_ref]

    n_sizes = [min(num_to_refine * size_factors[i], 1200) for i in range(L)]
    m_sizes = [min(num_as_ref * size_factors[i], 300) * m for i in range(L)]
    n_max, m_max = max(n_sizes), max(m_sizes)

    # ---- stage 1: gathers & per-level bookkeeping (plain JAX) ---------------
    q_list, kv_list, w_list, b_list, m_valid_list = [], [], [], [], []
    level_ctx, all_selected_anchors = [], []
    for lvl_idx, lvl_c in enumerate(inplanes):
        main_roi_feats = data['main']['roi_features'][lvl_idx]
        num_main = n_sizes[lvl_idx]
        num_ref = min(num_as_ref * size_factors[lvl_idx], 300)

        selected_main = get_selected_indices(mlvl_preds_act[lvl_idx], num_main)
        anchors = data['main']['anchors'][lvl_idx]                    # (A, 4)
        anchors_b = jnp.broadcast_to(anchors[None], (B,) + anchors.shape)
        all_selected_anchors.append(get_top_feats(anchors_b, selected_main))
        selected_ref = [get_selected_indices(mlvl_preds_ref_act[i][lvl_idx], num_ref)
                        for i in range(m)]

        # gather main roi features and original predictions for cls / loc / id
        roi_feats = [get_top_feats(main_roi_feats[i], selected_main) for i in range(3)]
        roi_preds = []
        for idx in range(3):
            if ROI_MAPPINGS[idx] == 'loc':
                c = ROI_PRED_DIMS[idx]
                gidx = jnp.broadcast_to(selected_main[:, :, None],
                                        selected_main.shape + (c,))
                roi_preds.append(jnp.take_along_axis(mlvl_preds[lvl_idx][idx],
                                                     gidx, axis=1))
            else:
                roi_preds.append(get_top_feats(data['main']['preds'][lvl_idx][idx],
                                               selected_main, is_pred=True))

        # gather reference (kv) roi features for the two relation heads (cls, id)
        # TODO(synk): at production N/M these gathers should move into the
        # kernel (scalar-prefetched indices + manual DMA gather from pl.ANY
        # refs) to avoid the HBM round trip of the gathered q/kv tensors.
        def gather_ref(idx):
            parts = [get_top_feats(data['ref'][i]['roi_features'][lvl_idx][idx],
                                   selected_ref[i]) for i in range(m)]
            return jnp.concatenate(parts, axis=1)                     # (B, M, C)

        iou_pred = get_top_feats(data['main']['preds'][lvl_idx][3],
                                 selected_main, is_pred=True)

        heads = [(roi_feats[0], gather_ref(0), params['cls_preds'][lvl_idx]),
                 (roi_feats[2], gather_ref(2), params['id_preds'])]
        for q_h, kv_h, (w_h, b_h) in heads:
            q_list.append(pad_rows(q_h, n_max))
            kv_list.append(pad_rows(kv_h, m_max))
            wp, bp = pack_head(w_h, b_h, lvl_c, P)
            w_list.append(wp)
            b_list.append(bp)
            m_valid_list.append(m_sizes[lvl_idx])

        level_ctx.append(dict(roi_feats=roi_feats, roi_preds=roi_preds,
                              iou_pred=iou_pred, n=num_main, c=lvl_c))

    q_all = jnp.stack(q_list).astype(jnp.bfloat16)        # (G, B, Nmax, C)
    kv_all = jnp.stack(kv_list).astype(jnp.bfloat16)      # (G, B, Mmax, C)
    w_all = jnp.stack(w_list)                             # (G, C, P) bf16
    b_all = jnp.stack(b_list)                             # (G, 1, P) f32
    m_valid = jnp.asarray(m_valid_list, jnp.int32)        # (G,)

    # ---- stage 2: ONE fused pallas_call over all (level, head) groups -------
    slab = fused_relation_heads(m_valid, q_all, kv_all, w_all, b_all)  # (G,B,Nmax,P)

    # ---- stage 3: unpack the lane-dense slab per level / head ---------------
    all_refined_preds, all_refined_feats, original_lvl_preds = [], [], []
    for lvl_idx, ctx in enumerate(level_ctx):
        n, lvl_c = ctx['n'], ctx['c']
        g_cls, g_id = 2 * lvl_idx, 2 * lvl_idx + 1
        feat_cls = slab[g_cls, :, :n, :lvl_c]
        pred_cls = slab[g_cls, :, :n, lvl_c:lvl_c + ROI_PRED_DIMS[0]]
        feat_id = slab[g_id, :, :n, :lvl_c]
        pred_id = slab[g_id, :, :n, lvl_c:lvl_c + ROI_PRED_DIMS[2]]

        refined_lvl_preds = [pred_cls, ctx['roi_preds'][1], pred_id, ctx['iou_pred']]
        refined_lvl_feats = [feat_cls, ctx['roi_feats'][1], feat_id]  # (B, N, C)
        original_preds_main = [ctx['roi_preds'][0], ctx['roi_preds'][1],
                               ctx['roi_preds'][2], ctx['iou_pred']]

        all_refined_preds.append(refined_lvl_preds)
        all_refined_feats.append(refined_lvl_feats)
        original_lvl_preds.append(original_preds_main)

    # TODO(synk): post_module.predictor.predict (anchor decode + NMS) and the
    # training loss branch are external modules; return the refined tensors.
    return {
        'refined_pred_main': all_refined_preds,
        'refined_feats_main': all_refined_feats,
        'original_pred_main': original_lvl_preds,
        'selected_anchors': all_selected_anchors,
    }


# ---------------------------------------------------------------------------
if __name__ == "__main__":
    B = 2
    inplanes = [32, 32]          # two FPN levels, embed_dim = 32
    spatials = [(8, 8), (4, 4)]

    root = jax.random.PRNGKey(0)
    k_params, k_main, k_r0, k_r1 = jax.random.split(root, 4)
    params = init_params(k_params, inplanes)

    def make_frame(key):
        roi_features, preds, anchors = [], [], []
        for (h, w), c in zip(spatials, inplanes):
            key, k1, k2, k3, k4, k5, k6, k7, k8 = jax.random.split(key, 9)
            roi_features.append([
                jax.random.normal(k1, (B, c, h, w), jnp.float32),     # cls feat
                jax.random.normal(k2, (B, c, h, w), jnp.float32),     # loc feat
                jax.random.normal(k3, (B, c, h, w), jnp.float32),     # id feat
            ])
            preds.append([
                jax.random.normal(k4, (B, NUM_ANCHORS * NUM_CLASSES_M1, h, w), jnp.float32),
                jax.random.normal(k5, (B, NUM_ANCHORS * 4, h, w), jnp.float32),
                jax.random.normal(k6, (B, NUM_ANCHORS * NUM_IDS, h, w), jnp.float32),
                jax.random.normal(k7, (B, NUM_ANCHORS * 1, h, w), jnp.float32),
            ])
            anchors.append(jax.random.normal(k8, (h * w * NUM_ANCHORS, 4), jnp.float32))
        return {'roi_features': roi_features, 'preds': preds,
                'anchors': anchors, 'image_info': None}

    data = {'main': make_frame(k_main),
            'ref': [make_frame(k_r0), make_frame(k_r1)]}

    out = relation_retina_forward(data, params, inplanes)
    out = jax.block_until_ready(out)

    # sanity on shapes of the Pallas-produced refined preds / feats
    assert out['refined_pred_main'][0][0].shape == (B, 32, NUM_CLASSES_M1)
    assert out['refined_pred_main'][0][2].shape == (B, 32, NUM_IDS)
    assert out['refined_pred_main'][1][0].shape == (B, 8, NUM_CLASSES_M1)
    assert out['refined_feats_main'][0][0].shape == (B, 32, inplanes[0])
    assert out['refined_feats_main'][1][2].shape == (B, 8, inplanes[1])
    assert not bool(jnp.any(jnp.isnan(out['refined_pred_main'][0][0].astype(jnp.float32))))
    print("KERNEL_OK")
</pallas_src>

<mosaic_0001>
module attributes {stable_mosaic.version = 11 : i64} {
  func.func @_fused_relation_heads_kernel(%arg0: i32, %arg1: memref<4xi32, #tpu.memory_space<smem>>, %arg2: memref<1x2x32x32xbf16, #tpu.memory_space<vmem>>, %arg3: memref<1x2x32x32xbf16, #tpu.memory_space<vmem>>, %arg4: memref<1x32x128xbf16, #tpu.memory_space<vmem>>, %arg5: memref<1x1x128xf32, #tpu.memory_space<vmem>>, %arg6: memref<1x2x32x128xbf16, #tpu.memory_space<vmem>>) attributes {dimension_semantics = [#tpu.dimension_semantics<parallel>], iteration_bounds = array<i64: 4>, scalar_prefetch = 1 : i64, scratch_operands = 0 : i64, tpu.core_type = #tpu.core_type<tc>, window_params = [{transform_indices = @transform_0, window_bounds = array<i64: 1, 2, 32, 32>}, {transform_indices = @transform_1, window_bounds = array<i64: 1, 2, 32, 32>}, {transform_indices = @transform_2, window_bounds = array<i64: 1, 32, 128>}, {transform_indices = @transform_3, window_bounds = array<i64: 1, 1, 128>}, {transform_indices = @transform_4, window_bounds = array<i64: 1, 2, 32, 128>}]} {
    %0 = arith.index_cast %arg0 : i32 to index
    %1 = memref.load %arg1[%0] : memref<4xi32, #tpu.memory_space<smem>>
    %c0 = arith.constant 0 : index
    %c0_0 = arith.constant 0 : index
    %c0_1 = arith.constant 0 : index
    %c0_2 = arith.constant 0 : index
    %2 = vector.load %arg2[%c0, %c0_0, %c0_1, %c0_2] : memref<1x2x32x32xbf16, #tpu.memory_space<vmem>>, vector<1x2x32x32xbf16>
    %3 = vector.shape_cast %2 : vector<1x2x32x32xbf16> to vector<2x32x32xbf16>
    %c0_3 = arith.constant 0 : index
    %c0_4 = arith.constant 0 : index
    %c0_5 = arith.constant 0 : index
    %c0_6 = arith.constant 0 : index
    %4 = vector.load %arg3[%c0_3, %c0_4, %c0_5, %c0_6] : memref<1x2x32x32xbf16, #tpu.memory_space<vmem>>, vector<1x2x32x32xbf16>
    %5 = vector.shape_cast %4 : vector<1x2x32x32xbf16> to vector<2x32x32xbf16>
    %6 = arith.extf %3 : vector<2x32x32xbf16> to vector<2x32x32xf32>
    %cst = arith.constant 0.176776692 : f32
    %7 = vector.broadcast %cst : f32 to vector<2x32x32xf32>
    %8 = arith.mulf %6, %7 : vector<2x32x32xf32>
    %9 = arith.truncf %8 : vector<2x32x32xf32> to vector<2x32x32xbf16>
    "tpu.trace_start"() <{level = 10 : i32, message = "bnc,bmc->bnm"}> : () -> ()
    %cst_7 = arith.constant dense<0.000000e+00> : vector<2x32x32xf32>
    %10 = tpu.matmul %9, %5, %cst_7 {dimension_numbers = #tpu.dot_dimension_numbers<[2], [2], [1], [1], [0, 0, 0, 1, 1, 1], [0], [0]>} : vector<2x32x32xbf16>, vector<2x32x32xbf16>, vector<2x32x32xf32> -> vector<2x32x32xf32>
    "tpu.trace_stop"() : () -> ()
    %11 = tpu.iota {dimensions = array<i32: 2>} : vector<2x32x32xi32>
    %12 = vector.broadcast %1 : i32 to vector<2x32x32xi32>
    %13 = arith.cmpi slt, %11, %12 : vector<2x32x32xi32>
    %cst_8 = arith.constant -1.000000e+30 : f32
    %14 = vector.broadcast %cst_8 : f32 to vector<2x32x32xf32>
    %15 = arith.select %13, %10, %14 : vector<2x32x32xi1>, vector<2x32x32xf32>
    %cst_9 = arith.constant dense<0xFF800000> : vector<2x32xf32>
    %16 = vector.multi_reduction <maximumf>, %15, %cst_9 [2] : vector<2x32x32xf32> to vector<2x32xf32>
    %17 = vector.shape_cast %16 : vector<2x32xf32> to vector<2x32x1xf32>
    %18 = vector.broadcast %17 : vector<2x32x1xf32> to vector<2x32x32xf32>
    %19 = arith.subf %15, %18 : vector<2x32x32xf32>
    %20 = arith.truncf %19 : vector<2x32x32xf32> to vector<2x32x32xbf16>
    %21 = math.exp %20 : vector<2x32x32xbf16>
    %22 = arith.extf %21 : vector<2x32x32xbf16> to vector<2x32x32xf32>
    %cst_10 = arith.constant dense<0.000000e+00> : vector<2x32xf32>
    %23 = vector.multi_reduction <add>, %22, %cst_10 [2] : vector<2x32x32xf32> to vector<2x32xf32>
    %24 = vector.shape_cast %23 : vector<2x32xf32> to vector<2x32x1xf32>
    "tpu.trace_start"() <{level = 10 : i32, message = "bnm,bmc->bnc"}> : () -> ()
    %cst_11 = arith.constant dense<0.000000e+00> : vector<2x32x32xf32>
    %25 = tpu.matmul %21, %5, %cst_11 {dimension_numbers = #tpu.dot_dimension_numbers<[2], [1], [1], [2], [0, 0, 0, 1, 1, 2], [0], [0]>} : vector<2x32x32xbf16>, vector<2x32x32xbf16>, vector<2x32x32xf32> -> vector<2x32x32xf32>
    "tpu.trace_stop"() : () -> ()
    %26 = tpu.reciprocal %24 {approx = true} : vector<2x32x1xf32> -> vector<2x32x1xf32>
    %27 = vector.broadcast %26 : vector<2x32x1xf32> to vector<2x32x32xf32>
    %28 = arith.mulf %25, %27 : vector<2x32x32xf32>
    %29 = arith.addf %6, %28 : vector<2x32x32xf32>
    %30 = arith.truncf %29 : vector<2x32x32xf32> to vector<2x32x32xbf16>
    %31 = vector.shape_cast %30 : vector<2x32x32xbf16> to vector<64x32xbf16>
    %c0_12 = arith.constant 0 : index
    %c0_13 = arith.constant 0 : index
    %c0_14 = arith.constant 0 : index
    %32 = vector.load %arg4[%c0_12, %c0_13, %c0_14] : memref<1x32x128xbf16, #tpu.memory_space<vmem>>, vector<1x32x128xbf16>
    %33 = vector.shape_cast %32 : vector<1x32x128xbf16> to vector<32x128xbf16>
    %cst_15 = arith.constant dense<0.000000e+00> : vector<64x128xf32>
    %34 = tpu.matmul %31, %33, %cst_15 {dimension_numbers = #tpu.dot_dimension_numbers<[1], [0], [0], [1], [0, 0, 1, 1], [], []>} : vector<64x32xbf16>, vector<32x128xbf16>, vector<64x128xf32> -> vector<64x128xf32>
    %35 = vector.shape_cast %34 : vector<64x128xf32> to vector<2x32x128xf32>
    %c0_16 = arith.constant 0 : index
    %c0_17 = arith.constant 0 : index
    %c0_18 = arith.constant 0 : index
    %36 = vector.load %arg5[%c0_16, %c0_17, %c0_18] : memref<1x1x128xf32, #tpu.memory_space<vmem>>, vector<1x1x128xf32>
    %37 = vector.shape_cast %36 : vector<1x1x128xf32> to vector<1x128xf32>
    %38 = vector.shape_cast %37 : vector<1x128xf32> to vector<1x1x128xf32>
    %39 = vector.broadcast %38 : vector<1x1x128xf32> to vector<2x32x128xf32>
    %40 = arith.addf %35, %39 : vector<2x32x128xf32>
    %41 = arith.truncf %40 : vector<2x32x128xf32> to vector<2x32x128xbf16>
    %c0_19 = arith.constant 0 : index
    %c0_20 = arith.constant 0 : index
    %c0_21 = arith.constant 0 : index
    %c0_22 = arith.constant 0 : index
    %42 = vector.load %arg6[%c0_19, %c0_20, %c0_21, %c0_22] : memref<1x2x32x128xbf16, #tpu.memory_space<vmem>>, vector<1x2x32x128xbf16>
    %43 = vector.shape_cast %42 : vector<1x2x32x128xbf16> to vector<2x32x128xbf16>
    %44 = vector.shape_cast %41 : vector<2x32x128xbf16> to vector<1x2x32x128xbf16>
    tpu.vector_store %arg6[%c0_19, %c0_20, %c0_21, %c0_22], %44 {strides = array<i32>} : memref<1x2x32x128xbf16, #tpu.memory_space<vmem>>, vector<1x2x32x128xbf16>,
    return
  }
  func.func @transform_0(%arg0: i32, %arg1: memref<4xi32, #tpu.memory_space<smem>>) -> (i32, i32, i32, i32) {
    %c0_i32 = arith.constant 0 : i32
    %c0_i32_0 = arith.constant 0 : i32
    %c0_i32_1 = arith.constant 0 : i32
    %c0_i32_2 = arith.constant 0 : i32
    return %arg0, %c0_i32, %c0_i32_0, %c0_i32_1 : i32, i32, i32, i32
  }
  func.func @transform_1(%arg0: i32, %arg1: memref<4xi32, #tpu.memory_space<smem>>) -> (i32, i32, i32, i32) {
    %c0_i32 = arith.constant 0 : i32
    %c0_i32_0 = arith.constant 0 : i32
    %c0_i32_1 = arith.constant 0 : i32
    %c0_i32_2 = arith.constant 0 : i32
    return %arg0, %c0_i32, %c0_i32_0, %c0_i32_1 : i32, i32, i32, i32
  }
  func.func @transform_2(%arg0: i32, %arg1: memref<4xi32, #tpu.memory_space<smem>>) -> (i32, i32, i32) {
    %c0_i32 = arith.constant 0 : i32
    %c0_i32_0 = arith.constant 0 : i32
    %c0_i32_1 = arith.constant 0 : i32
    return %arg0, %c0_i32, %c0_i32_0 : i32, i32, i32
  }
  func.func @transform_3(%arg0: i32, %arg1: memref<4xi32, #tpu.memory_space<smem>>) -> (i32, i32, i32) {
    %c0_i32 = arith.constant 0 : i32
    %c0_i32_0 = arith.constant 0 : i32
    %c0_i32_1 = arith.constant 0 : i32
    return %arg0, %c0_i32, %c0_i32_0 : i32, i32, i32
  }
  func.func @transform_4(%arg0: i32, %arg1: memref<4xi32, #tpu.memory_space<smem>>) -> (i32, i32, i32, i32) {
    %c0_i32 = arith.constant 0 : i32
    %c0_i32_0 = arith.constant 0 : i32
    %c0_i32_1 = arith.constant 0 : i32
    %c0_i32_2 = arith.constant 0 : i32
    return %arg0, %c0_i32, %c0_i32_0, %c0_i32_1 : i32, i32, i32, i32
  }
}

</mosaic_0001>

<bundles_post_ra>
// kernel: tpu_custom_call.1
= control target key start
LH: loop header
LB: loop body
LE: loop exit
PB: predicated region body
PF: predicated region fallthrough
CT: control target
= control target key end

     0   :  { %s1442_s18 = smov [#allocation3]   ;;  %s1854_s0 = inlined_call_operand.hbm [shape: s32[4], index: 0, kind: input, shape index: {}]   ;;  %s1855_s1 = inlined_call_operand.hbm [shape: bf16[4,2,32,32], index: 1, kind: input, shape index: {}]   ;;  %s1856_s2 = inlined_call_operand.hbm [shape: bf16[4,2,32,32], index: 2, kind: input, shape index: {}]   ;;  %s1857_s3 = inlined_call_operand.hbm [shape: bf16[4,32,128], index: 3, kind: input, shape index: {}]   ;;  %s1858_s4 = inlined_call_operand.vmem [shape: f32[4,1,128], index: 4, kind: input, shape index: {}]   ;;  %s1859_s5 = inlined_call_operand.hbm [shape: bf16[4,2,32,128], index: 5, kind: output, shape index: {}]  }
   0x1   :  { %1866 = sst [smem:[#allocation16_spill]] %s1855_s1 }
   0x2   :  { %1867 = sst [smem:[#allocation17_spill]] %s1856_s2 }
   0x3   :  { %11 = dma.hbm_to_smem %s1854_s0, 16, %s1442_s18, [#allocation2] }
   0x4   :  { %1412 = dma.done.wait [#allocation2], 16 }
   0x5   :  { %1413 = vsyncadd [#allocation2], 4294967280 }
   0x6   :  { %13 = sfence }
   0x7   :  { %14 = vsyncpa [#allocation5], 0 }
   0x8   :  { %16 = vsyncpa [#allocation5 + $0x1], 0 }
   0x9   :  { %17 = vsyncpa [#allocation8], 0 }
   0xa   :  { %19 = vsyncpa [#allocation8 + $0x1], 0 }
   0xb   :  { %20 = vsyncpa [#allocation6], 0 }
   0xc   :  { %22 = vsyncpa [#allocation6 + $0x1], 0  ;;  %s1484_s21 = smov 0   ;;  %s1486_s22 = smov 0  }
   0xd   :  { %s1488_s23 = smov 0   ;;  %s1490_s24 = smov 0  }
   0xe LB: > { %s1505_s0 = sadd.s32 4294967295, %s1440_s24   ;;  %s1014_s25 = sadd.s32 4294967294, %s1440_s24   ;;  %s1440_s24 = sphi %s1490_s24, %s1890_s24   ;;  %s1436_s23 = sphi %s1488_s23, %s1889_s23   ;;  %s1432_s22 = sphi %s1486_s22, %s1888_s22   ;;  %s1428_s21 = sphi %s1484_s21, %s1887_s21  }
   0xf   : > { %s1509_s26 = sadd.s32 1, %s1440_s24   ;;  %s35_s27 = sadd.s32 1, %s1436_s23 }
  0x10   : > { %s32_s28 = ssub.s32 %s1440_s24, %s1509_s26  ;;  %p42_p0 = scmp.ne.s32.totalorder %s1436_s23, %s1432_s22 }
  0x11   : > { %p33_p1 = scmp.eq.s32.totalorder %s32_s28, 0  ;;  %p43_p2 = scmp.eq.s32.totalorder %s1440_s24, 0 }
  0x12   : > { %p48_p3 = scmp.ne.s32.totalorder %s1432_s22, %s1428_s21  ;;  %p49_p4 = scmp.eq.s32.totalorder %s1505_s0, 0 }
  0x13   : > { %s1521_s29 = scalar_select %p33_p1, %s1436_s23, %s35_s27  }
  0x14   : > { %p44_p5 = por %p43_p2, %p42_p0  ;;  %p1523_p6 = por %p49_p4, %p48_p3 }
  0x15   : > { %1868 = sst [smem:[#allocation15_spill]] %s1521_s29  ;;  %p150_p7 = scmp.eq.s32.totalorder %s1505_s0, 3 }
  0x16   : > { %s1869_s30 = scalar_select %p1523_p6, 1, 0 }
  0x17   : > { %p156_p8 = scmp.eq.s32.totalorder %s1014_s25, 3  ;;  %p1209_p9 = scmp.lt.s32.totalorder %s1440_s24, 4 }
  0x18   : > { %p1529_p10 = por %p150_p7, %p42_p0  ;;  %s1538_s8 = sand.u32 1, %s1436_s23  }
  0x19   : > { %p1533_p11 = por %p156_p8, %p48_p3  ;;  %s1063_s9 = sshll.u32 %s1440_s24, 9 }
  0x1a   : > { %s1870_s6 = scalar_select %p1529_p10, 1, 0 }
  0x1b   : > { %s1871_s7 = scalar_select %p1533_p11, 1, 0 }
  0x1c   : > { %s1017_s10 = sshll.u32 %s1538_s8, 5  ;;  %p1542_p12 = pnand %p1209_p9, %p44_p5 }
  0x1d   : > { %s197_s12 = sand.u32 1, %s1440_s24   ;;  %s1873_s2 = sld [smem:[#allocation17_spill]] }
  0x1e   : > { %s201_s16 = scalar_lea.vmem [#allocation7], %s1017_s10  ;;  %s1559_s18 = scalar_lea.sflag [#allocation8], %s197_s12 }
  0x1f   : > { %s208_s17 = sshll.u32 %s201_s16, 4  ;;  %p1565_p1 = pneg %p1542_p12  ;;  %s1556_s17 = int_to_ptr.vmem [resolvable:$true] %s208_s17 }
  0x23   : > { %s1552_s15 = scalar_lea.hbm %s1873_s2, %s1063_s9  ;;  %s1291_s28 = scalar_lea.hbm %s1873_s2, 2048 }
  0x24   : > { %s1286_s19 = scalar_lea.hbm %s1552_s15, 512  ;;  %p1292_p4 = scmp.lt.s32.totalorder %s1552_s15, %s1873_s2 }
  0x25   : > { %p1287_p0 = scmp.ne.s32.totalorder %s1552_s15, %s1286_s19  ;;  %p1293_p5 = scmp.lt.s32.totalorder %s1291_s28, %s1286_s19 }
  0x27   : > { %p1289_p2 = pnand %p1565_p1, %p1287_p0  ;;  %p1294_p7 = por %p1293_p5, %p1292_p4 }
  0x29   : > { %p1290_p3 = pneg %p1289_p2 }
  0x2b   : > { %p1295_p8 = pnand %p1294_p7, %p1290_p3 }
  0x2d   : > { %1298 = shalt.err (!%p1295_p8)
}
  0x2e   : > { %s1299_s12 = scalar_lea.vmem %s1556_s17, 512  ;;  %s1443_s16 = smov [#allocation7]  }
  0x2f   : > { %p1300_p9 = scmp.ne.s32.totalorder %s1556_s17, %s1299_s12  ;;  %s1304_s25 = sshll.u32 %s1443_s16, 4  ;;  %s1305_s25 = int_to_ptr.vmem [resolvable:$false] %s1304_s25 }
  0x30   : > { %s1306_s27 = scalar_lea.vmem %s1305_s25, 1024  ;;  %p1307_p13 = scmp.lt.s32.totalorder %s1556_s17, %s1305_s25 }
  0x31   : > { %p1302_p0 = pnand %p1300_p9, %p1565_p1  ;;  %p1308_p11 = scmp.lt.s32.totalorder %s1306_s27, %s1299_s12 }
  0x33   : > { %p1303_p2 = pneg %p1302_p0  ;;  %p1309_p10 = por %p1308_p11, %p1307_p13 }
  0x35   : > { %p1310_p6 = pnand %p1309_p10, %p1303_p2 }
  0x37   : > { %1313 = shalt.err (!%p1310_p6)
}
  0x38   : > { %s1862_s19 = smov 64   ;;  %s1864_s28 = smov 4  }
  0x39   : > { %1201 = dma.hbm_to_vmem [thread:$0]  (!%p1542_p12), %s1552_s15, 512, %s1556_s17, %s1559_s18, %s1862_s19, %s1862_s19, %s1864_s28  }
  0x3a   : > { %p243_p10 = scmp.lt.s32.totalorder %s1440_s24, 5  ;;  %s1875_s1 = sld [smem:[#allocation16_spill]] }
  0x3b   : > { %p1876_p6 = scmp.ge.s32.totalorder %s1440_s24, 1  ;;  %s180_s25 = scalar_lea.vmem [#allocation4], %s1017_s10 }
  0x3c   : > { %s187_s27 = sshll.u32 %s180_s25, 4  ;;  %s1023_s15 = sshll.u32 %s1538_s8, 4  ;;  %s1607_s27 = int_to_ptr.vmem [resolvable:$true] %s187_s27 }
  0x3d   : > { %p1601_p11 = pnand %p1876_p6, %p243_p10  ;;  %s177_s17 = scalar_lea.sflag [#allocation5], %s1538_s8 }
  0x3f   : > { %s1877_s16 = scalar_select %p1601_p11, 1, 0 }
  0x40   : > { %s1597_s12 = scalar_lea.hbm %s1875_s1, %s1063_s9  ;;  %s1319_s14 = scalar_lea.hbm %s1875_s1, 2048 }
  0x41   : > { %s1314_s19 = scalar_lea.hbm %s1597_s12, 512  ;;  %p1320_p5 = scmp.lt.s32.totalorder %s1597_s12, %s1875_s1 }
  0x42   : > { %p1315_p13 = scmp.ne.s32.totalorder %s1597_s12, %s1314_s19  ;;  %p1321_p7 = scmp.lt.s32.totalorder %s1319_s14, %s1314_s19 }
  0x44   : > { %p1317_p3 = pnand %p1315_p13, %p1565_p1  ;;  %p1322_p8 = por %p1321_p7, %p1320_p5 }
  0x46   : > { %p1318_p4 = pneg %p1317_p3 }
  0x48   : > { %p1323_p9 = pnand %p1322_p8, %p1318_p4 }
  0x4a   : > { %1326 = shalt.err (!%p1323_p9)
}
  0x4b   : > { %s1327_s10 = scalar_lea.vmem %s1607_s27, 512  ;;  %s1446_s25 = smov [#allocation4]  }
  0x4c   : > { %p1328_p0 = scmp.ne.s32.totalorder %s1607_s27, %s1327_s10  ;;  %s1332_s9 = sshll.u32 %s1446_s25, 4  ;;  %s1333_s9 = int_to_ptr.vmem [resolvable:$false] %s1332_s9 }
  0x4d   : > { %s1334_s13 = scalar_lea.vmem %s1333_s9, 1024  ;;  %p1335_p6 = scmp.lt.s32.totalorder %s1607_s27, %s1333_s9 }
  0x4e   : > { %p1330_p2 = pnand %p1328_p0, %p1565_p1  ;;  %p1336_p13 = scmp.lt.s32.totalorder %s1334_s13, %s1327_s10 }
  0x50   : > { %p1331_p10 = pneg %p1330_p2  ;;  %p1337_p3 = por %p1336_p13, %p1335_p6 }
  0x52   : > { %p1338_p11 = pnand %p1337_p3, %p1331_p10 }
  0x54   : > { %1341 = shalt.err (!%p1338_p11)
}
  0x55   : > { %s1878_s2 = smov 4   ;;  %s1879_s19 = smov 64  }
  0x56   : > { %1198 = dma.hbm_to_vmem [thread:$0]  (!%p1542_p12), %s1597_s12, 512, %s1607_s27, %s177_s17, %s1879_s19, %s1879_s19, %s1878_s2  }
  0x57   : > { %s1065_s28 = sshll.u32 %s1440_s24, 8  ;;  %s222_s10 = scalar_lea.vmem [#allocation9], %s1023_s15 }
  0x58   : > { %s1638_s9 = scalar_lea.hbm %s1857_s3, %s1065_s28  ;;  %s229_s13 = sshll.u32 %s222_s10, 4  ;;  %s230_s13 = int_to_ptr.vmem [resolvable:$true] %s229_s13 }
  0x59   : > { %s1342_s1 = scalar_lea.hbm %s1638_s9, 256  ;;  %s1347_s27 = scalar_lea.hbm %s1857_s3, 1024 }
  0x5a   : > { %p1343_p11 = scmp.ne.s32.totalorder %s1638_s9, %s1342_s1  ;;  %p1348_p7 = scmp.lt.s32.totalorder %s1638_s9, %s1857_s3 }
  0x5b   : > { %p1349_p8 = scmp.lt.s32.totalorder %s1347_s27, %s1342_s1 }
  0x5c   : > { %p1345_p4 = pnand %p1343_p11, %p1565_p1 }
  0x5d   : > { %p1350_p9 = por %p1349_p8, %p1348_p7 }
  0x5e   : > { %p1346_p5 = pneg %p1345_p4 }
  0x60   : > { %p1351_p0 = pnand %p1350_p9, %p1346_p5 }
  0x62   : > { %1354 = shalt.err (!%p1351_p0)
}
  0x63   : > { %s1355_s8 = scalar_lea.vmem %s230_s13, 256  ;;  %s1447_s15 = smov [#allocation9]  }
  0x64   : > { %p1356_p2 = scmp.ne.s32.totalorder %s230_s13, %s1355_s8  ;;  %s1360_s28 = sshll.u32 %s1447_s15, 4  ;;  %s1361_s28 = int_to_ptr.vmem [resolvable:$false] %s1360_s28 }
  0x65   : > { %s1362_s25 = scalar_lea.vmem %s1361_s28, 512  ;;  %p1363_p13 = scmp.lt.s32.totalorder %s230_s13, %s1361_s28 }
  0x66   : > { %p1358_p10 = pnand %p1356_p2, %p1565_p1  ;;  %p1364_p3 = scmp.lt.s32.totalorder %s1362_s25, %s1355_s8 }
  0x68   : > { %p1359_p6 = pneg %p1358_p10  ;;  %p1365_p11 = por %p1364_p3, %p1363_p13 }
  0x6a   : > { %p1366_p4 = pnand %p1365_p11, %p1359_p6 }
  0x6c   : > { %1369 = shalt.err (!%p1366_p4)
}
  0x6d   : > { %1204 = dma.hbm_to_vmem [thread:$0]  (!%p1542_p12), %s1638_s9, 256, %s230_s13, %s1559_s18, %s1879_s19, %s1879_s19, %s1878_s2  }
  0x6e   : > { %p1880_p1 = scmp.ne.s32.totalorder %s1877_s16, 0 }
  0x6f   : > { %s1665_s1 = sand.u32 (!%p1880_p1), 1, %s1432_s22   ;;  %p1881_p5 = scmp.ne.s32.totalorder (!%p1880_p1), %s1869_s30, 0 }
  0x70   : > { %247 = sbr.rel (%p1880_p1) target bundleno = 930 (0x3a2), region = 36  ;;  %s1668_s29 = sshll.u32 (!%p1880_p1), %s1665_s1, 5 }
  0x71   : > { %s250_s20 = scalar_lea.sflag (!%p1880_p1), [#allocation5], %s1665_s1  ;;  %s253_s11 = scalar_lea.vmem (!%p1880_p1), [#allocation4], %s1668_s29 }
  0x75   : > { %1415 = dma.done.wait (%p1881_p5), %s250_s20, 512  }
  0x76   : > { %1417 = vsyncadd (%p1881_p5), %s250_s20, 4294966784  ;;  %s258_s18 = sand.u32 1, %s1505_s0   ;;  %s262_s2 = scalar_lea.vmem [#allocation7], %s1668_s29 }
  0x77   : > { %s259_s16 = scalar_lea.sflag [#allocation8], %s258_s18 }
  0x78   : > { %1419 = dma.done.wait (%p1881_p5), %s259_s16, 768  }
  0x79   : > { %1421 = vsyncadd (%p1881_p5), %s259_s16, 4294966528  ;;  %vm360_vm0 = vcmask 261120   ;;  %v1248_v0 = vld [vmem:[%s262_s2 + $0x8] sm:$0xff]   ;;  %v1682_v1 = vld [vmem:[%s262_s2 + $0x18] sm:$0xff]   ;;  %s313_s30 = sld [smem:[#allocation3 + %s1505_s0]]  ;;  %v493_v32 = vlaneseq  ;;  %s1029_s19 = sshll.u32 %s1665_s1, 4 }
  0x7a   : > { %1183 = vmatprep.subr.msk.bf16.mxu0 %vm360_vm0, %v1248_v0  ;;  %v371_v2 = vsel %vm360_vm0, %v1248_v0, 0  ;;  %v1250_v3 = vld [vmem:[%s262_s2] sm:$0xff]   ;;  %1185 = vmatprep.subr.msk.bf16.mxu1 %vm360_vm0, %v1682_v1  ;;  %v442_v4 = vsel %vm360_vm0, %v1682_v1, 0  ;;  %v1690_v5 = vld [vmem:[%s262_s2 + $0x10] sm:$0xff]   ;;  %v1697_v8 = vld [vmem:[%s253_s11 + $0x8] sm:$0xff]   ;;  %s271_s9 = scalar_lea.vmem [#allocation9], %s1029_s19 }
  0x7b   : > { %1140 = vmatpush3.bf16.xpose.msra.mxu0 %v371_v2  ;;  %1148 = vmatpush3.bf16.xpose.msra.mxu1 %v442_v4  ;;  %v1693_v6 = vld [vmem:[%s253_s11] sm:$0xff]   ;;  %v1695_v7 = vld [vmem:[%s253_s11 + $0x10] sm:$0xff]   ;;  %v1704_v12 = vld [vmem:[%s253_s11 + $0x18] sm:$0xff]   ;;  %v1081_v14 = vunpack.c.l.bf16 %v1697_v8  ;;  %v1082_v15 = vunpack.c.h.bf16 %v1697_v8  ;;  %v368_v21 = vsel %vm360_vm0, %v1250_v3, 0  ;;  %v439_v23 = vsel %vm360_vm0, %v1690_v5, 0  ;;  %p309_p12 = scmp.lt.s32.totalorder %s1505_s0, 3 }
  0x7c   : > { %1184 = vmatprep.subr.msk.bf16.mxu0 %vm360_vm0, %v1250_v3  ;;  %1186 = vmatprep.subr.msk.bf16.mxu1 %vm360_vm0, %v1690_v5  ;;  %v1077_v9 = vunpack.c.l.bf16 %v1693_v6  ;;  %v1078_v10 = vunpack.c.h.bf16 %v1693_v6  ;;  %v1085_v11 = vunpack.c.l.bf16 %v1695_v7  ;;  %v1086_v13 = vunpack.c.h.bf16 %v1695_v7  ;;  %s308_s17 = scalar_lea.vmem [#allocation10], %s1668_s29  ;;  %s1074_s8 = sshll.u32 %s1505_s0, 9 }
  0x7d   : > { %v1089_v16 = vunpack.c.l.bf16 %v1704_v12  ;;  %v1090_v20 = vunpack.c.h.bf16 %v1704_v12  ;;  %v340_v26 = vmul.f32 0.17677669, %v1081_v14  ;;  %v341_v27 = vmul.f32 0.17677669, %v1082_v15  ;;  %s310_s10 = scalar_select %p309_p12, %s1505_s0, 3 }
  0x7e   : > { %v338_v17 = vmul.f32 0.17677669, %v1077_v9  ;;  %v339_v18 = vmul.f32 0.17677669, %v1078_v10  ;;  %v342_v19 = vmul.f32 0.17677669, %v1085_v11  ;;  %s1812_s25 = scalar_lea.hbm %s1859_s5, %s1074_s8 }
  0x7f   : > { %v343_v22 = vmul.f32 0.17677669, %v1086_v13  ;;  %v344_v28 = vmul.f32 0.17677669, %v1089_v16  ;;  %v345_v29 = vmul.f32 0.17677669, %v1090_v20  ;;  %v347_v30 = vpack.c.bf16 %v341_v27, %v340_v26  ;;  %s311_s27 = scalar_lea.vmem %s1858_s4, %s310_s10 }
  0x80   : > { %v346_v24 = vpack.c.bf16 %v339_v18, %v338_v17  ;;  %v494_v33 = vand.u32 127, %v493_v32  ;;  %v495_v34 = vstv %s313_s30  ;;  %s889_s14 = sshll.u32 %s308_s17, 4  ;;  %s876_s29 = scalar_lea.sflag [#allocation6], %s1665_s1  ;;  %s1807_s14 = int_to_ptr.vmem [resolvable:$true] %s889_s14 }
  0x81   : > { %v348_v25 = vpack.c.bf16 %v343_v22, %v342_v19  ;;  %v349_v31 = vpack.c.bf16 %v345_v29, %v344_v28  ;;  %s1370_s20 = scalar_lea.vmem %s1807_s14, 512  ;;  %p1884_p8 = scmp.ne.s32.totalorder %s1870_s6, 0 }
  0x82   : > { %1143 = vmatprep.mubr.msk.bf16.mxu0 %vm360_vm0, %v346_v24  ;;  %vm1736_vm1 = vcmp.lt.s32.totalorder %v494_v33, %v495_v34  ;;  %p1371_p7 = scmp.ne.s32.totalorder %s1807_s14, %s1370_s20  ;;  %s1448_s0 = smov [#allocation10]  }
  0x83   : > { %1142 = vmatpush3.bf16.xpose.msra.mxu0 %v368_v21  ;;  %1150 = vmatpush3.bf16.xpose.msra.mxu1 %v439_v23  ;;  %s1374_s11 = sshll.u32 %s1448_s0, 4  ;;  %s1375_s11 = int_to_ptr.vmem [resolvable:$false] %s1374_s11 }
  0x84   : > { %1151 = vmatprep.mubr.msk.bf16.mxu1 %vm360_vm0, %v348_v25  ;;  %1155 = vmatprep.subr.bf16.mxu1 %v1248_v0  ;;  %p1372_p9 = pnand %p1371_p7, %p1884_p8  ;;  %s1376_s18 = scalar_lea.vmem %s1375_s11, 1024 }
  0x85   : > { %p1377_p2 = scmp.lt.s32.totalorder %s1807_s14, %s1375_s11  ;;  %p1378_p10 = scmp.lt.s32.totalorder %s1376_s18, %s1370_s20 }
  0x86   : > { %p1373_p0 = pneg %p1372_p9 }
  0x87   : > { %p1379_p6 = por %p1378_p10, %p1377_p2 }
  0x89   : > { %p1380_p13 = pnand %p1379_p6, %p1373_p0 }
  0x8a   : > { %1144 = vmatmul.mubr.msk.bf16.vlgmr.msra.gmra.mxu0 %vm360_vm0, %v347_v30  ;;  %1152 = vmatmul.mubr.msk.bf16.vlgmr.msra.gmra.mxu1 %vm360_vm0, %v349_v31 }
  0x8b   : > { %1156 = vmatpush3.bf16.msra.mxu1 %v1248_v0 }
  0x8c   : > { %1157 = vmatprep.subr.bf16.mxu1 %v1250_v3 }
  0x8f   : > { %1158 = vmatpush3.bf16.msra.mxu1 %v1250_v3 }
  0x90   : > { %1163 = vmatprep.subr.bf16.mxu1 %v1682_v1 }
 0x14a   : > { %v1145_v36 = vpop.f32.mrf.mxu0  ;;  %v1153_v38 = vpop.f32.mrf.mxu1 }
 0x14b   : > { %v499_v37 = vsel %vm1736_vm1, %v1145_v36, -1e+30  ;;  %v503_v57 = vsel %vm1736_vm1, %v1153_v38, -1e+30 }
 0x14c   : > { %v407_v39 = vpop.f32.mrf.mxu0  ;;  %v511_v40 = vsel %vm360_vm0, %v499_v37, -inf  ;;  %v478_v42 = vpop.f32.mrf.mxu1  ;;  %v523_v59 = vsel %vm360_vm0, %v503_v57, -inf }
 0x14d   : > { %v497_v41 = vsel %vm1736_vm1, %v407_v39, -1e+30  ;;  %512 = vmax.xlane.f32.xlu1 %v511_v40  ;;  %v501_v53 = vsel %vm1736_vm1, %v478_v42, -1e+30 }
 0x14e   : > { %v1146_v43 = vpop.f32.mrf.mxu0  ;;  %v505_v44 = vsel %vm360_vm0, %v497_v41, -inf  ;;  %v1154_v46 = vpop.f32.mrf.mxu1  ;;  %v517_v56 = vsel %vm360_vm0, %v501_v53, -inf }
 0x14f   : > { %v500_v45 = vsel %vm1736_vm1, %v1146_v43, -1e+30  ;;  %506 = vmax.xlane.f32.xlu0 %v505_v44  ;;  %v504_v55 = vsel %vm1736_vm1, %v1154_v46, -1e+30 }
 0x150   : > { %v410_v47 = vpop.f32.mrf.mxu0  ;;  %v514_v48 = vsel %vm360_vm0, %v500_v45, -inf  ;;  %v481_v50 = vpop.f32.mrf.mxu1  ;;  %v526_v58 = vsel %vm360_vm0, %v504_v55, -inf }
 0x151   : > { %v498_v49 = vsel %vm1736_vm1, %v410_v47, -1e+30  ;;  %515 = vmax.xlane.f32.xlu1 %v514_v48  ;;  %v502_v51 = vsel %vm1736_vm1, %v481_v50, -1e+30 }
 0x152   : > { %v508_v52 = vsel %vm360_vm0, %v498_v49, -inf  ;;  %v520_v54 = vsel %vm360_vm0, %v502_v51, -inf }
 0x153   : > { %509 = vmax.xlane.f32.xlu0 %v508_v52  ;;  %v1252_v52 = vld [vmem:[%s271_s9 + $0x8] sm:$0xff]  }
 0x154   : > { %1171 = vmatprep.subr.bf16.mxu0 %v1252_v52 }
 0x155   : > { %521 = vmax.xlane.f32.xlu1 %v520_v54  ;;  %1172 = vmatpush3.bf16.msra.mxu0 %v1252_v52 }
 0x157   : > { %518 = vmax.xlane.f32.xlu0 %v517_v56 }
 0x159   : > { %527 = vmax.xlane.f32.xlu1 %v526_v58 }
 0x15b   : > { %524 = vmax.xlane.f32.xlu0 %v523_v59 }
 0x1d6   : > { %v513_v60 = vpop.xlane.xlu1 %512 }
 0x1d7   : > { %v531_v63 = vsub.f32 %v499_v37, %v513_v60 }
 0x1d8   : > { %v507_v61 = vpop.xlane.xlu0 %506 }
 0x1d9   : > { %v529_v3 = vsub.f32 %v497_v41, %v507_v61 }
 0x1da   : > { %v516_v62 = vpop.xlane.xlu1 %515 }
 0x1db   : > { %v532_v0 = vsub.f32 %v500_v45, %v516_v62 }
 0x1dc   : > { %v510_v2 = vpop.xlane.xlu0 %509 }
 0x1dd   : > { %v538_v4 = vpack.c.bf16 %v532_v0, %v531_v63  ;;  %v530_v17 = vsub.f32 %v498_v49, %v510_v2 }
 0x1de   : > { %v522_v18 = vpop.xlane.xlu1 %521 }
 0x1df   : > { %v545_v19 = vmul.bf16 1069105081, %v538_v4  ;;  %v537_v21 = vpack.c.bf16 %v530_v17, %v529_v3  ;;  %v534_v24 = vsub.f32 %v502_v51, %v522_v18 }
 0x1e0   : > { %v519_v22 = vpop.xlane.xlu0 %518 }
 0x1e1   : > { %v542_v23 = vmul.bf16 1069105081, %v537_v21  ;;  %v533_v25 = vsub.f32 %v501_v53, %v519_v22  ;;  %1254 = vpow.bf16 %v545_v19  ;;  %v1253_v53 = vld [vmem:[%s271_s9] sm:$0xff]  }
 0x1e2   : > { %v528_v26 = vpop.xlane.xlu1 %527  ;;  %1173 = vmatprep.subr.bf16.mxu0 %v1253_v53 }
 0x1e3   : > { %1256 = vpow.bf16 %v542_v23  ;;  %v539_v27 = vpack.c.bf16 %v534_v24, %v533_v25  ;;  %v536_v30 = vsub.f32 %v504_v55, %v528_v26  ;;  %1174 = vmatpush3.bf16.msra.mxu0 %v1253_v53 }
 0x1e4   : > { %v525_v28 = vpop.xlane.xlu0 %524 }
 0x1e5   : > { %v548_v29 = vmul.bf16 1069105081, %v539_v27  ;;  %v535_v31 = vsub.f32 %v503_v57, %v525_v28 }
 0x1e7   : > { %1258 = vpow.bf16 %v548_v29  ;;  %v540_v32 = vpack.c.bf16 %v536_v30, %v535_v31 }
 0x1e9   : > { %v551_v33 = vmul.bf16 1069105081, %v540_v32 }
 0x1eb   : > { %1260 = vpow.bf16 %v551_v33 }
 0x1ef   : > { %v1255_v34 = vpop.eup %1254 }
 0x1f0   : > { %v556_v40 = vunpack.c.h.bf16 %v1255_v34  ;;  %v555_v41 = vunpack.c.l.bf16 %v1255_v34 }
 0x1f1   : > { %v1257_v35 = vpop.eup %1256 }
 0x1f2   : > { %1159 = vmatprep.mubr.msk.bf16.mxu1 %vm360_vm0, %v1257_v35  ;;  %v554_v36 = vunpack.c.h.bf16 %v1257_v35  ;;  %v553_v37 = vunpack.c.l.bf16 %v1257_v35  ;;  %v570_v43 = vsel %vm360_vm0, %v556_v40, 0.0  ;;  %v567_v44 = vsel %vm360_vm0, %v555_v41, 0.0 }
 0x1f3   : > { %1160 = vmatmul.mubr.msk.bf16.vlgmr.msra.gmra.mxu1 %vm360_vm0, %v1255_v34 }
 0x1f4   : > { %1164 = vmatpush3.bf16.msra.mxu1 %v1682_v1  ;;  %v564_v38 = vsel %vm360_vm0, %v554_v36, 0.0  ;;  %v561_v39 = vsel %vm360_vm0, %v553_v37, 0.0 }
 0x1f5   : > { %v1259_v42 = vpop.eup %1258  ;;  %565 = vadd.xlane.f32.xlu1 %v564_v38  ;;  %562 = vadd.xlane.f32.xlu0 %v561_v39 }
 0x1f6   : > { %1165 = vmatprep.subr.bf16.mxu1 %v1690_v5  ;;  %1167 = vmatprep.mubr.msk.bf16.mxu1 %vm360_vm0, %v1259_v42  ;;  %v558_v1 = vunpack.c.h.bf16 %v1259_v42  ;;  %v557_v45 = vunpack.c.l.bf16 %v1259_v42 }
 0x1f8   : > { %1166 = vmatpush3.bf16.msra.mxu1 %v1690_v5  ;;  %v576_v47 = vsel %vm360_vm0, %v558_v1, 0.0  ;;  %v573_v48 = vsel %vm360_vm0, %v557_v45, 0.0 }
 0x1f9   : > { %v1261_v46 = vpop.eup %1260  ;;  %571 = vadd.xlane.f32.xlu1 %v570_v43  ;;  %568 = vadd.xlane.f32.xlu0 %v567_v44 }
 0x1fa   : > { %v560_v49 = vunpack.c.h.bf16 %v1261_v46  ;;  %v559_v50 = vunpack.c.l.bf16 %v1261_v46 }
 0x1fb   : > { %1168 = vmatmul.mubr.msk.bf16.vlgmr.msra.gmra.mxu1 %vm360_vm0, %v1261_v46 }
 0x1fc   : > { %v582_v5 = vsel %vm360_vm0, %v560_v49, 0.0  ;;  %v579_v51 = vsel %vm360_vm0, %v559_v50, 0.0 }
 0x1fd   : > { %577 = vadd.xlane.f32.xlu1 %v576_v47  ;;  %574 = vadd.xlane.f32.xlu0 %v573_v48 }
 0x201   : > { %583 = vadd.xlane.f32.xlu1 %v582_v5  ;;  %580 = vadd.xlane.f32.xlu0 %v579_v51 }
 0x27e   : > { %v566_v54 = vpop.xlane.xlu1 %565  ;;  %v563_v55 = vpop.xlane.xlu0 %562 }
 0x27f   : > { %1262 = vrcp.f32 %v563_v55 }
 0x282   : > { %v572_v56 = vpop.xlane.xlu1 %571  ;;  %v569_v57 = vpop.xlane.xlu0 %568 }
 0x283   : > { %1264 = vrcp.f32 %v572_v56 }
 0x284   : > { %1266 = vrcp.f32 %v569_v57 }
 0x285   : > { %1268 = vrcp.f32 %v566_v54 }
 0x286   : > { %v578_v58 = vpop.xlane.xlu1 %577  ;;  %v575_v59 = vpop.xlane.xlu0 %574 }
 0x287   : > { %1270 = vrcp.f32 %v575_v59 }
 0x28a   : > { %v584_v60 = vpop.xlane.xlu1 %583  ;;  %v581_v61 = vpop.xlane.xlu0 %580 }
 0x28b   : > { %1272 = vrcp.f32 %v584_v60 }
 0x28c   : > { %1274 = vrcp.f32 %v581_v61  ;;  %v1263_v0 = vpop.eup %1262 }
 0x28d   : > { %1276 = vrcp.f32 %v578_v58 }
 0x290   : > { %v1265_v2 = vpop.eup %1264 }
 0x291   : > { %v1267_v4 = vpop.eup %1266 }
 0x292   : > { %v1269_v19 = vpop.eup %1268 }
 0x294   : > { %v1271_v30 = vpop.eup %1270 }
 0x298   : > { %v1273_v32 = vpop.eup %1272 }
 0x299   : > { %v1275_v35 = vpop.eup %1274 }
 0x2b3   : > { %v1161_v62 = vpop.f32.mrf.mxu1 }
 0x2b4   : > { %v709_v21 = vmul.f32 %v1267_v4, %v1161_v62 }
 0x2b5   : > { %v627_v63 = vpop.f32.mrf.mxu1 }
 0x2b6   : > { %v707_v17 = vmul.f32 %v1263_v0, %v627_v63  ;;  %v717_v28 = vadd.f32 %v1081_v14, %v709_v21 }
 0x2b7   : > { %v1162_v3 = vpop.f32.mrf.mxu1 }
 0x2b8   : > { %v710_v18 = vmul.f32 %v1265_v2, %v1162_v3  ;;  %v715_v26 = vadd.f32 %v1077_v9, %v707_v17  ;;  %v1277_v9 = vpop.eup %1276 }
 0x2b9   : > { %v630_v22 = vpop.f32.mrf.mxu1 }
 0x2ba   : > { %v708_v23 = vmul.f32 %v1269_v19, %v630_v22  ;;  %v718_v24 = vadd.f32 %v1082_v15, %v710_v18 }
 0x2bb   : > { %v1169_v25 = vpop.f32.mrf.mxu1 }
 0x2bc   : > { %v716_v27 = vadd.f32 %v1078_v10, %v708_v23  ;;  %v724_v33 = vpack.c.bf16 %v718_v24, %v717_v28  ;;  %v713_v37 = vmul.f32 %v1275_v35, %v1169_v25 }
 0x2bd   : > { %v684_v29 = vpop.f32.mrf.mxu1 }
 0x2be   : > { %v723_v31 = vpack.c.bf16 %v716_v27, %v715_v26  ;;  %v711_v36 = vmul.f32 %v1271_v30, %v684_v29  ;;  %v721_v39 = vadd.f32 %v1089_v16, %v713_v37 }
 0x2bf   : > { %v1170_v34 = vpop.f32.mrf.mxu1 }
 0x2c0   : > { %v714_v15 = vmul.f32 %v1273_v32, %v1170_v34  ;;  %1175 = vmatprep.mubr.msk.bf16.mxu0 %vm360_vm0, %v723_v31  ;;  %v719_v14 = vadd.f32 %v1085_v11, %v711_v36 }
 0x2c1   : > { %v687_v6 = vpop.f32.mrf.mxu1  ;;  %1176 = vmatmul.mubr.msk.bf16.vlgmr.msra.gmra.mxu0 %vm360_vm0, %v724_v33 }
 0x2c2   : > { %v712_v8 = vmul.f32 %v1277_v9, %v687_v6  ;;  %v722_v10 = vadd.f32 %v1090_v20, %v714_v15  ;;  %v1049_v20 = vld [vmem:[%s311_s27] ss:$0 sm:$0xff] }
 0x2c4   : > { %v720_v38 = vadd.f32 %v1086_v13, %v712_v8  ;;  %v726_v41 = vpack.c.bf16 %v722_v10, %v721_v39 }
 0x2c6   : > { %v725_v40 = vpack.c.bf16 %v720_v38, %v719_v14 }
 0x2c8   : > { %1179 = vmatprep.mubr.msk.bf16.mxu0 %vm360_vm0, %v725_v40 }
 0x2c9   : > { %1180 = vmatmul.mubr.msk.bf16.gmra.mxu0 %vm360_vm0, %v726_v41 }
 0x381   : > { %v1177_v11 = vpop.f32.mrf.mxu0 }
 0x382   : > { %v829_v42 = vadd.f32 %v1177_v11, %v1049_v20 }
 0x383   : > { %v789_v7 = vpop.f32.mrf.mxu0 }
 0x384   : > { %v827_v43 = vadd.f32 %v1049_v20, %v789_v7 }
 0x385   : > { %v1178_v13 = vpop.f32.mrf.mxu0 }
 0x386   : > { %v830_v12 = vadd.f32 %v1178_v13, %v1049_v20 }
 0x387   : > { %v792_v16 = vpop.f32.mrf.mxu0 }
 0x388   : > { %v1099_v44 = vpack.c.bf16 %v830_v12, %v829_v42  ;;  %v828_v1 = vadd.f32 %v1049_v20, %v792_v16 }
 0x389   : > { %v1181_v45 = vpop.f32.mrf.mxu0 }
 0x38a   : > { %1114 = vst [vmem:[%s308_s17 + $0x8] sm:$0xff] %v1099_v44   ;;  %v1094_v46 = vpack.c.bf16 %v828_v1, %v827_v43  ;;  %v833_v49 = vadd.f32 %v1181_v45, %v1049_v20 }
 0x38b   : > { %v805_v47 = vpop.f32.mrf.mxu0 }
 0x38c   : > { %1095 = vst [vmem:[%s308_s17] sm:$0xff] %v1094_v46   ;;  %v831_v51 = vadd.f32 %v1049_v20, %v805_v47 }
 0x38d   : > { %v1182_v48 = vpop.f32.mrf.mxu0 }
 0x38e   : > { %v834_v50 = vadd.f32 %v1182_v48, %v1049_v20 }
 0x38f   : > { %v808_v5 = vpop.f32.mrf.mxu0 }
 0x390   : > { %v1109_v52 = vpack.c.bf16 %v834_v50, %v833_v49  ;;  %v832_v53 = vadd.f32 %v1049_v20, %v808_v5 }
 0x392   : > { %1116 = vst [vmem:[%s308_s17 + $0x18] sm:$0xff] %v1109_v52   ;;  %v1104_v54 = vpack.c.bf16 %v832_v53, %v831_v51 }
 0x394   : > { %1115 = vst [vmem:[%s308_s17 + $0x10] sm:$0xff] %v1104_v54  }
 0x395   : > { %1383 = shalt.err (!%p1380_p13)
}
 0x396   : > { %s1384_s16 = scalar_lea.hbm %s1812_s25, 512  ;;  %s1388_s19 = scalar_lea.hbm %s1859_s5, 2048 }
 0x397   : > { %p1385_p3 = scmp.ne.s32.totalorder %s1812_s25, %s1384_s16  ;;  %p1389_p1 = scmp.lt.s32.totalorder %s1812_s25, %s1859_s5 }
 0x398   : > { %p1390_p5 = scmp.lt.s32.totalorder %s1388_s19, %s1384_s16 }
 0x399   : > { %p1386_p11 = pnand %p1385_p3, %p1884_p8 }
 0x39a   : > { %p1391_p12 = por %p1390_p5, %p1389_p1 }
 0x39b   : > { %p1387_p4 = pneg %p1386_p11 }
 0x39d   : > { %p1392_p7 = pnand %p1391_p12, %p1387_p4 }
 0x39f   : > { %1395 = shalt.err (!%p1392_p7)
}
 0x3a0   : > { %s1449_s13 = smov 64   ;;  %s1450_s12 = smov 4  }
 0x3a1   : > { %1193 = dma.vmem_to_hbm [thread:$0]  (%p1884_p8), %s1807_s14, 512, %s1812_s25, %s876_s29, %s1449_s13, %s1449_s13, %s1450_s12  }
 0x3a2 PF: > { %p1210_p9 = scmp.ge.s32.totalorder %s1440_s24, 2  ;;  %s904_s27 = sand.u32 1, %s1428_s21  }
 0x3a3   : > { %p1885_p0 = scmp.ne.s32.totalorder %s1871_s7, 0  ;;  %s905_s17 = scalar_lea.sflag [#allocation6], %s904_s27 }
 0x3a5   : > { %p1206_p2 = pnand %p1210_p9, %p1885_p0 }
 0x3a7   : > { %p1207_p10 = pneg %p1206_p2 }
 0x3a9   : > { %1423 = dma.done.wait (%p1207_p10), %s905_s17, 512  }
 0x3aa   : > { %1425 = vsyncadd (%p1207_p10), %s905_s17, 4294966784  ;;  %s1886_s8 = sld [smem:[#allocation15_spill]]  ;;  %p25_p6 = scmp.ge.s32.totalorder %s1509_s26, 6  }
 0x3ab   : > { %s1887_s21 = smov %s1432_s22  ;;  %s1888_s22 = smov %s1436_s23 }
 0x3ac   : > { %s1890_s24 = smov %s1509_s26  ;;  %27 = sbr.rel (!%p25_p6) target bundleno = 14 (0xe), region = 108 }
 0x3b0   : > { %s1889_s23 = smov %s1886_s8 }
 0x3b1   :  { %910 = vsyncpa [#allocation5], 1 }
 0x3b2   :  { %912 = vsyncpa [#allocation5 + $0x1], 1 }
 0x3b3   :  { %913 = vsyncpa [#allocation8], 1 }
 0x3b4   :  { %915 = vsyncpa [#allocation8 + $0x1], 1 }
 0x3b5   :  { %916 = vsyncpa [#allocation6], 1 }
 0x3b6   :  { %918 = vsyncpa [#allocation6 + $0x1], 1 }

</bundles_post_ra>
